<compile_context>
chip_gen: v5e
topology: v5e:2x2
jax: 0.10.0
libtpu: 0.0.40
codegen_flags: <defaults>
</compile_context>

<pallas_src>
import jax
import jax.numpy as jnp
from jax.experimental import pallas as pl
from jax.experimental.pallas import tpu as pltpu

IN_DIM, H1, H2, H3, OUT_DIM = 121, 64, 128, 64, 242
# Lane-padded (multiple-of-128) feature dims.
P_IN, P_H1, P_H2, P_H3, P_OUT = 128, 128, 128, 128, 256


def qnetwork_kernel(x_ref,
                    w1_ref, b1_ref,
                    w2_ref, b2_ref,
                    w3_ref, b3_ref,
                    w4_ref, b4_ref,
                    o_ref):
    # x: (TB, 128) bf16; weights bf16; biases f32; accumulation in f32 on MXU.
    x = x_ref[...]

    h = jnp.dot(x, w1_ref[...], preferred_element_type=jnp.float32) + b1_ref[...]
    h = jnp.maximum(h, 0.0).astype(jnp.bfloat16)

    h = jnp.dot(h, w2_ref[...], preferred_element_type=jnp.float32) + b2_ref[...]
    h = jnp.maximum(h, 0.0).astype(jnp.bfloat16)

    h = jnp.dot(h, w3_ref[...], preferred_element_type=jnp.float32) + b3_ref[...]
    h = jnp.maximum(h, 0.0).astype(jnp.bfloat16)

    out = jnp.dot(h, w4_ref[...], preferred_element_type=jnp.float32) + b4_ref[...]
    o_ref[...] = out.astype(o_ref.dtype)


def qnetwork_forward(x, packed, *, tb=256):
    """x: [batch, 121] float32.  packed: padded bf16 weights / f32 biases."""
    batch = x.shape[0]
    bp = tb * pl.cdiv(batch, tb)                      # batch padded to tile

    # Zero-pad batch to a tile multiple and features 121 -> 128; cast to bf16.
    x_p = jnp.pad(x.astype(jnp.bfloat16),
                  ((0, bp - batch), (0, P_IN - IN_DIM)))

    vmem = pltpu.MemorySpace.VMEM

    def resident(shape):
        # Constant index_map -> same block every grid step -> stays in VMEM.
        return pl.BlockSpec(shape, lambda i: (0,) * len(shape),
                            memory_space=vmem)

    x_spec = pl.BlockSpec((tb, P_IN), lambda i: (i, 0), memory_space=vmem)
    o_spec = pl.BlockSpec((tb, P_OUT), lambda i: (i, 0), memory_space=vmem)

    w1, b1 = packed["w1"], packed["b1"]
    w2, b2 = packed["w2"], packed["b2"]
    w3, b3 = packed["w3"], packed["b3"]
    w4, b4 = packed["w4"], packed["b4"]

    out = pl.pallas_call(
        qnetwork_kernel,
        out_shape=jax.ShapeDtypeStruct((bp, P_OUT), jnp.float32),
        grid=(bp // tb,),
        in_specs=[
            x_spec,
            resident(w1.shape), resident(b1.shape),
            resident(w2.shape), resident(b2.shape),
            resident(w3.shape), resident(b3.shape),
            resident(w4.shape), resident(b4.shape),
        ],
        out_specs=o_spec,
        compiler_params=pltpu.CompilerParams(
            dimension_semantics=("parallel",)),   # 2-TC sharding on v7x
    )(x_p, w1, b1, w2, b2, w3, b3, w4, b4)

    return out[:batch, :OUT_DIM]


def init_params(key):
    """PyTorch-style nn.Linear init: U(-1/sqrt(fan_in), 1/sqrt(fan_in))."""
    dims = [(IN_DIM, H1), (H1, H2), (H2, H3), (H3, OUT_DIM)]
    params = {}
    keys = jax.random.split(key, 2 * len(dims))
    for i, (fan_in, fan_out) in enumerate(dims):
        bound = 1.0 / (fan_in ** 0.5)
        params[f"w{i+1}"] = jax.random.uniform(
            keys[2 * i], (fan_in, fan_out),
            minval=-bound, maxval=bound, dtype=jnp.float32)
        params[f"b{i+1}"] = jax.random.uniform(
            keys[2 * i + 1], (1, fan_out),
            minval=-bound, maxval=bound, dtype=jnp.float32)
    return params


def pack_params(params):
    """Zero-pad to lane-multiple shapes; weights bf16, biases f32."""
    padded = [(P_IN, P_H1), (P_H1, P_H2), (P_H2, P_H3), (P_H3, P_OUT)]
    packed = {}
    for i, (pin, pout) in enumerate(padded, start=1):
        w = params[f"w{i}"]
        b = params[f"b{i}"]
        wp = jnp.zeros((pin, pout), jnp.bfloat16)
        wp = wp.at[:w.shape[0], :w.shape[1]].set(w.astype(jnp.bfloat16))
        bp = jnp.zeros((1, pout), jnp.float32)
        bp = bp.at[:, :b.shape[1]].set(b)
        packed[f"w{i}"] = wp
        packed[f"b{i}"] = bp
    return packed


def qnetwork_reference_f32(x, params):
    """Unpadded full-f32 reference (matches the PyTorch module exactly)."""
    h = jnp.maximum(x @ params["w1"] + params["b1"], 0.0)
    h = jnp.maximum(h @ params["w2"] + params["b2"], 0.0)
    h = jnp.maximum(h @ params["w3"] + params["b3"], 0.0)
    return h @ params["w4"] + params["b4"]


def qnetwork_reference_matched(x, packed):
    """Reference with the same padded bf16 weights / f32 accumulation."""
    xp = jnp.pad(x.astype(jnp.bfloat16), ((0, 0), (0, P_IN - IN_DIM)))
    h = jnp.dot(xp, packed["w1"], preferred_element_type=jnp.float32) + packed["b1"]
    h = jnp.maximum(h, 0.0).astype(jnp.bfloat16)
    h = jnp.dot(h, packed["w2"], preferred_element_type=jnp.float32) + packed["b2"]
    h = jnp.maximum(h, 0.0).astype(jnp.bfloat16)
    h = jnp.dot(h, packed["w3"], preferred_element_type=jnp.float32) + packed["b3"]
    h = jnp.maximum(h, 0.0).astype(jnp.bfloat16)
    out = jnp.dot(h, packed["w4"], preferred_element_type=jnp.float32) + packed["b4"]
    return out[:, :OUT_DIM]


if __name__ == "__main__":
    key = jax.random.PRNGKey(0)
    pkey, xkey = jax.random.split(key)

    params = init_params(pkey)
    packed = pack_params(params)

    batch = 8
    x = jax.random.normal(xkey, (batch, IN_DIM), dtype=jnp.float32)

    out = qnetwork_forward(x, packed)
    out = jax.block_until_ready(out)
    assert out.shape == (batch, OUT_DIM)

    # Tight check vs a reference doing the identical bf16/f32-accum math.
    ref_bf16 = qnetwork_reference_matched(x, packed)
    assert jnp.allclose(out, ref_bf16, atol=2e-2, rtol=2e-2), (
        float(jnp.max(jnp.abs(out - ref_bf16))))

    # Looser check vs the exact f32 PyTorch-equivalent forward pass.
    ref_f32 = qnetwork_reference_f32(x, params)
    assert jnp.allclose(out, ref_f32, atol=5e-2, rtol=5e-2), (
        float(jnp.max(jnp.abs(out - ref_f32))))

    print("KERNEL_OK")
</pallas_src>

<mosaic_0001>
module attributes {stable_mosaic.version = 11 : i64} {
  func.func @qnetwork_kernel(%arg0: i32, %arg1: memref<256x128xbf16, #tpu.memory_space<vmem>>, %arg2: memref<128x128xbf16, #tpu.memory_space<vmem>>, %arg3: memref<1x128xf32, #tpu.memory_space<vmem>>, %arg4: memref<128x128xbf16, #tpu.memory_space<vmem>>, %arg5: memref<1x128xf32, #tpu.memory_space<vmem>>, %arg6: memref<128x128xbf16, #tpu.memory_space<vmem>>, %arg7: memref<1x128xf32, #tpu.memory_space<vmem>>, %arg8: memref<128x256xbf16, #tpu.memory_space<vmem>>, %arg9: memref<1x256xf32, #tpu.memory_space<vmem>>, %arg10: memref<256x256xf32, #tpu.memory_space<vmem>>) attributes {dimension_semantics = [#tpu.dimension_semantics<parallel>], iteration_bounds = array<i64: 1>, scalar_prefetch = 0 : i64, scratch_operands = 0 : i64, tpu.core_type = #tpu.core_type<tc>, window_params = [{transform_indices = @transform_0, window_bounds = array<i64: 256, 128>}, {pipeline_mode = #tpu.pipeline_mode<synchronous>, transform_indices = @transform_1, window_bounds = array<i64: 128, 128>}, {pipeline_mode = #tpu.pipeline_mode<synchronous>, transform_indices = @transform_2, window_bounds = array<i64: 1, 128>}, {pipeline_mode = #tpu.pipeline_mode<synchronous>, transform_indices = @transform_3, window_bounds = array<i64: 128, 128>}, {pipeline_mode = #tpu.pipeline_mode<synchronous>, transform_indices = @transform_4, window_bounds = array<i64: 1, 128>}, {pipeline_mode = #tpu.pipeline_mode<synchronous>, transform_indices = @transform_5, window_bounds = array<i64: 128, 128>}, {pipeline_mode = #tpu.pipeline_mode<synchronous>, transform_indices = @transform_6, window_bounds = array<i64: 1, 128>}, {pipeline_mode = #tpu.pipeline_mode<synchronous>, transform_indices = @transform_7, window_bounds = array<i64: 128, 256>}, {pipeline_mode = #tpu.pipeline_mode<synchronous>, transform_indices = @transform_8, window_bounds = array<i64: 1, 256>}, {transform_indices = @transform_9, window_bounds = array<i64: 256, 256>}]} {
    %c0 = arith.constant 0 : index
    %c0_0 = arith.constant 0 : index
    %0 = vector.load %arg1[%c0, %c0_0] : memref<256x128xbf16, #tpu.memory_space<vmem>>, vector<256x128xbf16>
    %c0_1 = arith.constant 0 : index
    %c0_2 = arith.constant 0 : index
    %1 = vector.load %arg2[%c0_1, %c0_2] : memref<128x128xbf16, #tpu.memory_space<vmem>>, vector<128x128xbf16>
    %cst = arith.constant dense<0.000000e+00> : vector<256x128xf32>
    %2 = tpu.matmul %0, %1, %cst {dimension_numbers = #tpu.dot_dimension_numbers<[1], [0], [0], [1], [0, 0, 1, 1], [], []>} : vector<256x128xbf16>, vector<128x128xbf16>, vector<256x128xf32> -> vector<256x128xf32>
    %c0_3 = arith.constant 0 : index
    %c0_4 = arith.constant 0 : index
    %3 = vector.load %arg3[%c0_3, %c0_4] : memref<1x128xf32, #tpu.memory_space<vmem>>, vector<1x128xf32>
    %4 = vector.broadcast %3 : vector<1x128xf32> to vector<256x128xf32>
    %5 = arith.addf %2, %4 : vector<256x128xf32>
    %cst_5 = arith.constant 0.000000e+00 : f32
    %6 = vector.broadcast %cst_5 : f32 to vector<256x128xf32>
    %7 = arith.maximumf %5, %6 : vector<256x128xf32>
    %8 = arith.truncf %7 : vector<256x128xf32> to vector<256x128xbf16>
    %c0_6 = arith.constant 0 : index
    %c0_7 = arith.constant 0 : index
    %9 = vector.load %arg4[%c0_6, %c0_7] : memref<128x128xbf16, #tpu.memory_space<vmem>>, vector<128x128xbf16>
    %cst_8 = arith.constant dense<0.000000e+00> : vector<256x128xf32>
    %10 = tpu.matmul %8, %9, %cst_8 {dimension_numbers = #tpu.dot_dimension_numbers<[1], [0], [0], [1], [0, 0, 1, 1], [], []>} : vector<256x128xbf16>, vector<128x128xbf16>, vector<256x128xf32> -> vector<256x128xf32>
    %c0_9 = arith.constant 0 : index
    %c0_10 = arith.constant 0 : index
    %11 = vector.load %arg5[%c0_9, %c0_10] : memref<1x128xf32, #tpu.memory_space<vmem>>, vector<1x128xf32>
    %12 = vector.broadcast %11 : vector<1x128xf32> to vector<256x128xf32>
    %13 = arith.addf %10, %12 : vector<256x128xf32>
    %cst_11 = arith.constant 0.000000e+00 : f32
    %14 = vector.broadcast %cst_11 : f32 to vector<256x128xf32>
    %15 = arith.maximumf %13, %14 : vector<256x128xf32>
    %16 = arith.truncf %15 : vector<256x128xf32> to vector<256x128xbf16>
    %c0_12 = arith.constant 0 : index
    %c0_13 = arith.constant 0 : index
    %17 = vector.load %arg6[%c0_12, %c0_13] : memref<128x128xbf16, #tpu.memory_space<vmem>>, vector<128x128xbf16>
    %cst_14 = arith.constant dense<0.000000e+00> : vector<256x128xf32>
    %18 = tpu.matmul %16, %17, %cst_14 {dimension_numbers = #tpu.dot_dimension_numbers<[1], [0], [0], [1], [0, 0, 1, 1], [], []>} : vector<256x128xbf16>, vector<128x128xbf16>, vector<256x128xf32> -> vector<256x128xf32>
    %c0_15 = arith.constant 0 : index
    %c0_16 = arith.constant 0 : index
    %19 = vector.load %arg7[%c0_15, %c0_16] : memref<1x128xf32, #tpu.memory_space<vmem>>, vector<1x128xf32>
    %20 = vector.broadcast %19 : vector<1x128xf32> to vector<256x128xf32>
    %21 = arith.addf %18, %20 : vector<256x128xf32>
    %cst_17 = arith.constant 0.000000e+00 : f32
    %22 = vector.broadcast %cst_17 : f32 to vector<256x128xf32>
    %23 = arith.maximumf %21, %22 : vector<256x128xf32>
    %24 = arith.truncf %23 : vector<256x128xf32> to vector<256x128xbf16>
    %c0_18 = arith.constant 0 : index
    %c0_19 = arith.constant 0 : index
    %25 = vector.load %arg8[%c0_18, %c0_19] : memref<128x256xbf16, #tpu.memory_space<vmem>>, vector<128x256xbf16>
    %cst_20 = arith.constant dense<0.000000e+00> : vector<256x256xf32>
    %26 = tpu.matmul %24, %25, %cst_20 {dimension_numbers = #tpu.dot_dimension_numbers<[1], [0], [0], [1], [0, 0, 1, 1], [], []>} : vector<256x128xbf16>, vector<128x256xbf16>, vector<256x256xf32> -> vector<256x256xf32>
    %c0_21 = arith.constant 0 : index
    %c0_22 = arith.constant 0 : index
    %27 = vector.load %arg9[%c0_21, %c0_22] : memref<1x256xf32, #tpu.memory_space<vmem>>, vector<1x256xf32>
    %28 = vector.broadcast %27 : vector<1x256xf32> to vector<256x256xf32>
    %29 = arith.addf %26, %28 : vector<256x256xf32>
    %c0_23 = arith.constant 0 : index
    %c0_24 = arith.constant 0 : index
    %30 = vector.load %arg10[%c0_23, %c0_24] : memref<256x256xf32, #tpu.memory_space<vmem>>, vector<256x256xf32>
    tpu.vector_store %arg10[%c0_23, %c0_24], %29 {strides = array<i32>} : memref<256x256xf32, #tpu.memory_space<vmem>>, vector<256x256xf32>,
    return
  }
  func.func @transform_0(%arg0: i32) -> (i32, i32) {
    %c0_i32 = arith.constant 0 : i32
    %c0_i32_0 = arith.constant 0 : i32
    return %arg0, %c0_i32 : i32, i32
  }
  func.func @transform_1(%arg0: i32) -> (i32, i32) {
    %c0_i32 = arith.constant 0 : i32
    %c0_i32_0 = arith.constant 0 : i32
    %c0_i32_1 = arith.constant 0 : i32
    return %c0_i32, %c0_i32_0 : i32, i32
  }
  func.func @transform_2(%arg0: i32) -> (i32, i32) {
    %c0_i32 = arith.constant 0 : i32
    %c0_i32_0 = arith.constant 0 : i32
    %c0_i32_1 = arith.constant 0 : i32
    return %c0_i32, %c0_i32_0 : i32, i32
  }
  func.func @transform_3(%arg0: i32) -> (i32, i32) {
    %c0_i32 = arith.constant 0 : i32
    %c0_i32_0 = arith.constant 0 : i32
    %c0_i32_1 = arith.constant 0 : i32
    return %c0_i32, %c0_i32_0 : i32, i32
  }
  func.func @transform_4(%arg0: i32) -> (i32, i32) {
    %c0_i32 = arith.constant 0 : i32
    %c0_i32_0 = arith.constant 0 : i32
    %c0_i32_1 = arith.constant 0 : i32
    return %c0_i32, %c0_i32_0 : i32, i32
  }
  func.func @transform_5(%arg0: i32) -> (i32, i32) {
    %c0_i32 = arith.constant 0 : i32
    %c0_i32_0 = arith.constant 0 : i32
    %c0_i32_1 = arith.constant 0 : i32
    return %c0_i32, %c0_i32_0 : i32, i32
  }
  func.func @transform_6(%arg0: i32) -> (i32, i32) {
    %c0_i32 = arith.constant 0 : i32
    %c0_i32_0 = arith.constant 0 : i32
    %c0_i32_1 = arith.constant 0 : i32
    return %c0_i32, %c0_i32_0 : i32, i32
  }
  func.func @transform_7(%arg0: i32) -> (i32, i32) {
    %c0_i32 = arith.constant 0 : i32
    %c0_i32_0 = arith.constant 0 : i32
    %c0_i32_1 = arith.constant 0 : i32
    return %c0_i32, %c0_i32_0 : i32, i32
  }
  func.func @transform_8(%arg0: i32) -> (i32, i32) {
    %c0_i32 = arith.constant 0 : i32
    %c0_i32_0 = arith.constant 0 : i32
    %c0_i32_1 = arith.constant 0 : i32
    return %c0_i32, %c0_i32_0 : i32, i32
  }
  func.func @transform_9(%arg0: i32) -> (i32, i32) {
    %c0_i32 = arith.constant 0 : i32
    %c0_i32_0 = arith.constant 0 : i32
    return %arg0, %c0_i32 : i32, i32
  }
}

</mosaic_0001>

<bundles_post_ra>
// kernel: tpu_custom_call.1
= control target key start
LH: loop header
LB: loop body
LE: loop exit
PB: predicated region body
PF: predicated region fallthrough
CT: control target
= control target key end

     0   :  { %14 = vsyncpa [#allocation3], 0  ;;  %s2007_s0 = inlined_call_operand.hbm [shape: bf16[256,128], index: 0, kind: input, shape index: {}]   ;;  %s2008_s1 = inlined_call_operand.hbm [shape: bf16[128,128], index: 1, kind: input, shape index: {}]   ;;  %s2009_s2 = inlined_call_operand.vmem [shape: f32[1,128], index: 2, kind: input, shape index: {}]   ;;  %s2010_s3 = inlined_call_operand.hbm [shape: bf16[128,128], index: 3, kind: input, shape index: {}]   ;;  %s2011_s4 = inlined_call_operand.hbm [shape: f32[1,128], index: 4, kind: input, shape index: {}]   ;;  %s2012_s5 = inlined_call_operand.hbm [shape: bf16[128,128], index: 5, kind: input, shape index: {}]   ;;  %s2013_s6 = inlined_call_operand.vmem [shape: f32[1,128], index: 6, kind: input, shape index: {}]   ;;  %s2014_s7 = inlined_call_operand.hbm [shape: bf16[128,256], index: 7, kind: input, shape index: {}]   ;;  %s2015_s8 = inlined_call_operand.vmem [shape: f32[1,256], index: 8, kind: input, shape index: {}]   ;;  %s2016_s9 = inlined_call_operand.hbm [shape: f32[256,256], index: 9, kind: output, shape index: {}]  }
   0x1   :  { %15 = vsyncpa [#allocation6], 0 }
   0x2   :  { %16 = vsyncpa [#allocation9], 0 }
   0x3   :  { %17 = vsyncpa [#allocation12], 0 }
   0x4   :  { %18 = vsyncpa [#allocation4], 0  ;;  %s36_s11 = sshll.u32 %s2008_s1, 4  ;;  %s1732_s12 = smov [#allocation5]   ;;  %s37_s11 = int_to_ptr.hbm [resolvable:$true] %s36_s11 }
   0x5   :  { %s38_s13 = sshll.u32 %s1732_s12, 4  ;;  %s65_s16 = sshll.u32 %s2011_s4, 4  ;;  %s39_s13 = int_to_ptr.vmem [resolvable:$true] %s38_s13  ;;  %s66_s16 = int_to_ptr.hbm [resolvable:$true] %s65_s16 }
   0x6   :  { %s1733_s17 = smov 64   ;;  %s1734_s18 = smov 4  }
   0x7   :  { %44 = dma.hbm_to_vmem [thread:$0]  %s37_s11, 1024, %s39_s13, [#allocation6], %s1733_s17, %s1733_s17, %s1734_s18  }
   0x8   :  { %s1735_s19 = smov [#allocation8]   ;;  %s23_s1 = sshll.u32 %s2007_s0, 4  ;;  %s24_s1 = int_to_ptr.hbm [resolvable:$true] %s23_s1 }
   0x9   :  { %s67_s20 = sshll.u32 %s1735_s19, 4  ;;  %s51_s4 = sshll.u32 %s2010_s3, 4  ;;  %s68_s20 = int_to_ptr.vmem [resolvable:$true] %s67_s20  ;;  %s52_s4 = int_to_ptr.hbm [resolvable:$true] %s51_s4 }
   0xa   :  { %70 = dma.hbm_to_vmem [thread:$0]  %s66_s16, 16, %s68_s20, [#allocation9]  }
   0xb   :  { %s1736_s25 = smov [#allocation2]   ;;  %s1737_s27 = smov [#allocation7]  }
   0xc   :  { %s25_s26 = sshll.u32 %s1736_s25, 4  ;;  %s53_s28 = sshll.u32 %s1737_s27, 4  ;;  %s26_s26 = int_to_ptr.vmem [resolvable:$true] %s25_s26  ;;  %s54_s28 = int_to_ptr.vmem [resolvable:$true] %s53_s28 }
   0xd   :  { %31 = dma.hbm_to_vmem [thread:$0]  %s24_s1, 2048, %s26_s26, [#allocation3], %s1733_s17, %s1733_s17, %s1734_s18  }
   0xe   :  { %s75_s0 = sshll.u32 %s2012_s5, 4  ;;  %s90_s11 = sshll.u32 %s2014_s7, 4  ;;  %s76_s0 = int_to_ptr.hbm [resolvable:$true] %s75_s0  ;;  %s91_s11 = int_to_ptr.hbm [resolvable:$true] %s90_s11 }
   0xf   :  { %59 = dma.hbm_to_vmem [thread:$0]  %s52_s4, 1024, %s54_s28, [#allocation6], %s1733_s17, %s1733_s17, %s1734_s18  }
  0x10   :  { %s1738_s12 = smov [#allocation10]   ;;  %s1739_s14 = smov [#allocation11]  }
  0x11   :  { %s77_s13 = sshll.u32 %s1738_s12, 4  ;;  %s92_s5 = sshll.u32 %s1739_s14, 4  ;;  %s78_s13 = int_to_ptr.vmem [resolvable:$true] %s77_s13  ;;  %s93_s5 = int_to_ptr.vmem [resolvable:$true] %s92_s5 }
  0x12   :  { %83 = dma.hbm_to_vmem [thread:$0]  %s76_s0, 1024, %s78_s13, [#allocation9], %s1733_s17, %s1733_s17, %s1734_s18  }
  0x13   :  { %s1740_s15 = smov 128   ;;  %s1741_s16 = smov 8  }
  0x14   :  { %98 = dma.hbm_to_vmem [thread:$0]  %s91_s11, 2048, %s93_s5, [#allocation12], %s1740_s15, %s1740_s15, %s1741_s16  }
  0x15   :  { %1722 = dma.done.wait [#allocation3], 2048  }
  0x16   :  { %1723 = vsyncadd [#allocation3], 4294965248 }
  0x17   :  { %1724 = dma.done.wait [#allocation6], 2048  }
  0x18   :  { %1725 = vsyncadd [#allocation6], 4294965248 }
  0x19   :  { %1726 = dma.done.wait [#allocation9], 1040  }
  0x1a   :  { %1727 = vsyncadd [#allocation9], 4294966256 }
  0x1b   :  { %1728 = dma.done.wait [#allocation12], 2048  }
  0x1c   :  { %1729 = vsyncadd [#allocation12], 4294965248  ;;  %v1481_v0 = vld [vmem:[#allocation5 + $0x38] sm:$0xff]  ;;  %v1480_v1 = vld [vmem:[#allocation5 + $0x30] sm:$0xff]  ;;  %s1218_s1 = sshll.u32 %s2016_s9, 4  ;;  %s1743_s23 = smov 256   ;;  %s1219_s1 = int_to_ptr.hbm [resolvable:$true] %s1218_s1 }
  0x1d   :  { %321 = vmatpush.bf16.msra.mxu0 %v1481_v0  ;;  %1514 = vmatpush.bf16.msra.mxu1 %v1481_v0  ;;  %v1479_v2 = vld [vmem:[#allocation5 + $0x28] sm:$0xff]  ;;  %v1478_v3 = vld [vmem:[#allocation5 + $0x20] sm:$0xff]  ;;  %v1477_v4 = vld [vmem:[#allocation5 + $0x18] sm:$0xff]  ;;  %s1744_s24 = smov 16  }
  0x1e   :  { %1515 = vmatpush.bf16.msra.mxu2 %v1481_v0  ;;  %1516 = vmatpush.bf16.msra.mxu3 %v1481_v0  ;;  %v1476_v5 = vld [vmem:[#allocation5 + $0x10] sm:$0xff]  ;;  %v1475_v6 = vld [vmem:[#allocation5 + $0x8] sm:$0xff]  ;;  %v1474_v7 = vld [vmem:[#allocation5] sm:$0xff] }
  0x1f   :  { %v1458_v8 = vld [vmem:[#allocation2] sm:$0xff]  ;;  %v1459_v9 = vld [vmem:[#allocation2 + $0x8] sm:$0xff]  ;;  %v1489_v11 = vld [vmem:[#allocation7 + $0x38] sm:$0xff] }
  0x20   :  { %v1462_v10 = vld [vmem:[#allocation2 + $0x20] sm:$0xff]  ;;  %v1488_v12 = vld [vmem:[#allocation7 + $0x30] sm:$0xff]  ;;  %v1487_v13 = vld [vmem:[#allocation7 + $0x28] sm:$0xff] }
  0x21   :  { %322 = vmatpush.bf16.msra.mxu0 %v1480_v1  ;;  %1517 = vmatpush.bf16.msra.mxu1 %v1480_v1  ;;  %v1486_v14 = vld [vmem:[#allocation7 + $0x20] sm:$0xff]  ;;  %v1460_v15 = vld [vmem:[#allocation2 + $0x10] sm:$0xff]  ;;  %v1463_v16 = vld [vmem:[#allocation2 + $0x28] sm:$0xff] }
  0x22   :  { %1518 = vmatpush.bf16.msra.mxu2 %v1480_v1  ;;  %1519 = vmatpush.bf16.msra.mxu3 %v1480_v1  ;;  %v1485_v17 = vld [vmem:[#allocation7 + $0x18] sm:$0xff]  ;;  %v1466_v18 = vld [vmem:[#allocation2 + $0x40] sm:$0xff]  ;;  %v1484_v19 = vld [vmem:[#allocation7 + $0x10] sm:$0xff] }
  0x23   :  { %v1483_v20 = vld [vmem:[#allocation7 + $0x8] sm:$0xff]  ;;  %v1461_v21 = vld [vmem:[#allocation2 + $0x18] sm:$0xff]  ;;  %v1464_v22 = vld [vmem:[#allocation2 + $0x30] sm:$0xff] }
  0x24   :  { %v1465_v23 = vld [vmem:[#allocation2 + $0x38] sm:$0xff]  ;;  %v1467_v24 = vld [vmem:[#allocation2 + $0x48] sm:$0xff]  ;;  %v1482_v25 = vld [vmem:[#allocation7] sm:$0xff] }
  0x25   :  { %323 = vmatpush.bf16.msra.mxu0 %v1479_v2  ;;  %1520 = vmatpush.bf16.msra.mxu1 %v1479_v2  ;;  %v1468_v26 = vld [vmem:[#allocation2 + $0x50] sm:$0xff]  ;;  %v1828_v28 = vld [vmem:[%s2009_s2] ss:$0 sm:$0xff]  ;;  %v1469_v29 = vld [vmem:[#allocation2 + $0x58] sm:$0xff] }
  0x26   :  { %1521 = vmatpush.bf16.msra.mxu2 %v1479_v2  ;;  %1522 = vmatpush.bf16.msra.mxu3 %v1479_v2  ;;  %v1470_v37 = vld [vmem:[#allocation2 + $0x60] sm:$0xff]  ;;  %v1471_v45 = vld [vmem:[#allocation2 + $0x68] sm:$0xff]  ;;  %v1472_v55 = vld [vmem:[#allocation2 + $0x70] sm:$0xff] }
  0x27   :  { %v1497_v53 = vld [vmem:[#allocation10 + $0x38] sm:$0xff]  ;;  %v1496_v63 = vld [vmem:[#allocation10 + $0x30] sm:$0xff]  ;;  %v1495_v2 = vld [vmem:[#allocation10 + $0x28] sm:$0xff] }
  0x28   :  { %v1473_v1 = vld [vmem:[#allocation2 + $0x78] sm:$0xff] }
  0x29   :  { %324 = vmatpush.bf16.msra.mxu0 %v1478_v3  ;;  %1523 = vmatpush.bf16.msra.mxu1 %v1478_v3 }
  0x2a   :  { %1524 = vmatpush.bf16.msra.mxu2 %v1478_v3  ;;  %1525 = vmatpush.bf16.msra.mxu3 %v1478_v3 }
  0x2d   :  { %325 = vmatpush.bf16.msra.mxu0 %v1477_v4  ;;  %1526 = vmatpush.bf16.msra.mxu1 %v1477_v4 }
  0x2e   :  { %1527 = vmatpush.bf16.msra.mxu2 %v1477_v4  ;;  %1528 = vmatpush.bf16.msra.mxu3 %v1477_v4 }
  0x31   :  { %326 = vmatpush.bf16.msra.mxu0 %v1476_v5  ;;  %1529 = vmatpush.bf16.msra.mxu1 %v1476_v5 }
  0x32   :  { %1530 = vmatpush.bf16.msra.mxu2 %v1476_v5  ;;  %1531 = vmatpush.bf16.msra.mxu3 %v1476_v5 }
  0x35   :  { %327 = vmatpush.bf16.msra.mxu0 %v1475_v6  ;;  %1532 = vmatpush.bf16.msra.mxu1 %v1475_v6 }
  0x36   :  { %1533 = vmatpush.bf16.msra.mxu2 %v1475_v6  ;;  %1534 = vmatpush.bf16.msra.mxu3 %v1475_v6 }
  0x39   :  { %328 = vmatpush.bf16.msra.mxu0 %v1474_v7  ;;  %1535 = vmatpush.bf16.msra.mxu1 %v1474_v7 }
  0x3a   :  { %1536 = vmatpush.bf16.msra.mxu2 %v1474_v7  ;;  %1537 = vmatpush.bf16.msra.mxu3 %v1474_v7 }
  0x3c   :  { %329 = vmatmul.bf16.vlgmr.msra.gmra.mxu0 %v1458_v8  ;;  %349 = vmatmul.bf16.vlgmr.msra.gmra.mxu1 %v1462_v10  ;;  %v1493_v10 = vld [vmem:[#allocation10 + $0x18] sm:$0xff] }
  0x3d   :  { %526 = vmatpush.bf16.msrb.mxu1 %v1489_v11  ;;  %369 = vmatmul.bf16.vlgmr.msra.gmra.mxu2 %v1466_v18  ;;  %v1492_v18 = vld [vmem:[#allocation10 + $0x10] sm:$0xff] }
  0x3e   :  { %389 = vmatmul.bf16.vlgmr.msra.gmra.mxu3 %v1470_v37  ;;  %731 = vmatpush.bf16.msrb.mxu2 %v1497_v53 }
  0x41   :  { %527 = vmatpush.bf16.msrb.mxu1 %v1488_v12 }
  0x42   :  { %732 = vmatpush.bf16.msrb.mxu2 %v1496_v63 }
  0x45   :  { %528 = vmatpush.bf16.msrb.mxu1 %v1487_v13 }
  0x46   :  { %733 = vmatpush.bf16.msrb.mxu2 %v1495_v2 }
  0x49   :  { %529 = vmatpush.bf16.msrb.mxu1 %v1486_v14 }
  0x4c   :  { %334 = vmatmul.bf16.gmra.mxu0 %v1459_v9  ;;  %354 = vmatmul.bf16.gmra.mxu1 %v1463_v16  ;;  %v1494_v9 = vld [vmem:[#allocation10 + $0x20] sm:$0xff] }
  0x4d   :  { %530 = vmatpush.bf16.msrb.mxu1 %v1485_v17  ;;  %374 = vmatmul.bf16.gmra.mxu2 %v1467_v24 }
  0x4e   :  { %394 = vmatmul.bf16.gmra.mxu3 %v1471_v45  ;;  %734 = vmatpush.bf16.msrb.mxu2 %v1494_v9 }
  0x51   :  { %531 = vmatpush.bf16.msrb.mxu1 %v1484_v19  ;;  %v1491_v19 = vld [vmem:[#allocation10 + $0x8] sm:$0xff] }
  0x52   :  { %735 = vmatpush.bf16.msrb.mxu2 %v1493_v10 }
  0x55   :  { %532 = vmatpush.bf16.msrb.mxu1 %v1483_v20 }
  0x56   :  { %736 = vmatpush.bf16.msrb.mxu2 %v1492_v18 }
  0x59   :  { %533 = vmatpush.bf16.msrb.mxu1 %v1482_v25 }
  0x5a   :  { %737 = vmatpush.bf16.msrb.mxu2 %v1491_v19 }
  0x5c   :  { %339 = vmatmul.bf16.gmra.mxu0 %v1460_v15  ;;  %359 = vmatmul.bf16.gmra.mxu1 %v1464_v22 }
  0x5d   :  { %379 = vmatmul.bf16.gmra.mxu2 %v1468_v26 }
  0x5e   :  { %399 = vmatmul.bf16.gmra.mxu3 %v1472_v55 }
  0x6c   :  { %344 = vmatmul.bf16.gmra.mxu0 %v1461_v21  ;;  %364 = vmatmul.bf16.gmra.mxu1 %v1465_v23 }
  0x6d   :  { %384 = vmatmul.bf16.gmra.mxu2 %v1469_v29 }
  0x6e   :  { %404 = vmatmul.bf16.gmra.mxu3 %v1473_v1 }
  0xb9   :  { %v330_v27 = vpop.f32.mrf.mxu0  ;;  %v350_v51 = vpop.f32.mrf.mxu1 }
  0xba   :  { %v331_v30 = vadd.f32 %v1828_v28, %v330_v27  ;;  %v351_v3 = vadd.f32 %v1828_v28, %v350_v51  ;;  %v1490_v27 = vld [vmem:[#allocation10] sm:$0xff] }
  0xbb   :  { %738 = vmatpush.bf16.msrb.mxu2 %v1490_v27 }
  0xbc   :  { %v410_v33 = vmax.f32 %v331_v30, 0.0  ;;  %v418_v5 = vmax.f32 %v351_v3, 0.0 }
  0xc0   :  { %v370_v25 = vpop.f32.mrf.mxu2 }
  0xc1   :  { %v332_v31 = vpop.f32.mrf.mxu0  ;;  %v352_v56 = vpop.f32.mrf.mxu1  ;;  %v371_v37 = vadd.f32 %v1828_v28, %v370_v25 }
  0xc2   :  { %v333_v32 = vadd.f32 %v1828_v28, %v332_v31  ;;  %v353_v4 = vadd.f32 %v1828_v28, %v352_v56 }
  0xc4   :  { %v411_v34 = vmax.f32 %v333_v32, 0.0  ;;  %v419_v6 = vmax.f32 %v353_v4, 0.0 }
  0xc6   :  { %v442_v35 = vpack.c.bf16 %v411_v34, %v410_v33  ;;  %v446_v8 = vpack.c.bf16 %v419_v6, %v418_v5 }
  0xc8   :  { %534 = vmatmul.bf16.vlgmr.msrb.gmra.mxu1 %v442_v35  ;;  %v372_v32 = vpop.f32.mrf.mxu2 }
  0xc9   :  { %v335_v36 = vpop.f32.mrf.mxu0  ;;  %v355_v0 = vpop.f32.mrf.mxu1 }
  0xca   :  { %v336_v38 = vadd.f32 %v1828_v28, %v335_v36  ;;  %v356_v12 = vadd.f32 %v1828_v28, %v355_v0 }
  0xcc   :  { %v412_v41 = vmax.f32 %v336_v38, 0.0  ;;  %v420_v14 = vmax.f32 %v356_v12, 0.0  ;;  %v373_v38 = vadd.f32 %v1828_v28, %v372_v32 }
  0xd0   :  { %v375_v36 = vpop.f32.mrf.mxu2 }
  0xd1   :  { %v337_v39 = vpop.f32.mrf.mxu0  ;;  %v357_v7 = vpop.f32.mrf.mxu1 }
  0xd2   :  { %v338_v40 = vadd.f32 %v1828_v28, %v337_v39  ;;  %v358_v13 = vadd.f32 %v1828_v28, %v357_v7  ;;  %v426_v39 = vmax.f32 %v371_v37, 0.0  ;;  %v390_v7 = vpop.f32.mrf.mxu3 }
  0xd4   :  { %v413_v42 = vmax.f32 %v338_v40, 0.0  ;;  %v421_v15 = vmax.f32 %v358_v13, 0.0  ;;  %v427_v40 = vmax.f32 %v373_v38, 0.0  ;;  %v1452_v38 = vld [vmem:[#allocation11 + $0x70] sm:$0xf] }
  0xd6   :  { %v443_v43 = vpack.c.bf16 %v413_v42, %v412_v41  ;;  %v447_v16 = vpack.c.bf16 %v421_v15, %v420_v14 }
  0xd8   :  { %539 = vmatmul.bf16.gmra.mxu1 %v443_v43  ;;  %v377_v41 = vpop.f32.mrf.mxu2  ;;  %v450_v43 = vpack.c.bf16 %v427_v40, %v426_v39  ;;  %v1513_v39 = vld [vmem:[#allocation11 + $0x74] sm:$0xf0] }
  0xd9   :  { %v340_v44 = vpop.f32.mrf.mxu0  ;;  %v360_v11 = vpop.f32.mrf.mxu1  ;;  %v1453_v40 = vor.u32 %v1513_v39, %v1452_v38 }
  0xda   :  { %v341_v46 = vadd.f32 %v1828_v28, %v340_v44  ;;  %v361_v20 = vadd.f32 %v1828_v28, %v360_v11  ;;  %v1848_v44 = vld [vmem:[#allocation8] ss:$0 sm:$0xff]  ;;  %v392_v15 = vpop.f32.mrf.mxu3 }
  0xdb   :  { %v393_v27 = vadd.f32 %v1828_v28, %v392_v15  ;;  %970 = vmatpush.bf16.msrb.mxu3 %v1453_v40  ;;  %v1507_v15 = vld [vmem:[#allocation11 + $0x44] sm:$0xf0] }
  0xdc   :  { %v414_v49 = vmax.f32 %v341_v46, 0.0  ;;  %v422_v23 = vmax.f32 %v361_v20, 0.0 }
  0xe1   :  { %v342_v47 = vpop.f32.mrf.mxu0  ;;  %v362_v17 = vpop.f32.mrf.mxu1 }
  0xe2   :  { %v343_v48 = vadd.f32 %v1828_v28, %v342_v47  ;;  %v363_v21 = vadd.f32 %v1828_v28, %v362_v17  ;;  %v380_v47 = vpop.f32.mrf.mxu2 }
  0xe4   :  { %v415_v50 = vmax.f32 %v343_v48, 0.0  ;;  %v423_v24 = vmax.f32 %v363_v21, 0.0  ;;  %v376_v48 = vadd.f32 %v1828_v28, %v375_v36 }
  0xe6   :  { %v444_v52 = vpack.c.bf16 %v415_v50, %v414_v49  ;;  %v448_v26 = vpack.c.bf16 %v423_v24, %v422_v23  ;;  %v378_v49 = vadd.f32 %v1828_v28, %v377_v41  ;;  %v428_v53 = vmax.f32 %v376_v48, 0.0  ;;  %v395_v23 = vpop.f32.mrf.mxu3  ;;  %v1512_v41 = vld [vmem:[#allocation11 + $0x74] sm:$0xf] }
  0xe7   :  { %v396_v48 = vadd.f32 %v1828_v28, %v395_v23 }
  0xe8   :  { %544 = vmatmul.bf16.gmra.mxu1 %v444_v52 }
  0xe9   :  { %v345_v54 = vpop.f32.mrf.mxu0  ;;  %v365_v22 = vpop.f32.mrf.mxu1 }
  0xea   :  { %v346_v57 = vadd.f32 %v1828_v28, %v345_v54  ;;  %v366_v30 = vadd.f32 %v1828_v28, %v365_v22  ;;  %v429_v54 = vmax.f32 %v378_v49, 0.0 }
  0xec   :  { %v416_v60 = vmax.f32 %v346_v57, 0.0  ;;  %v424_v33 = vmax.f32 %v366_v30, 0.0  ;;  %v451_v57 = vpack.c.bf16 %v429_v54, %v428_v53  ;;  %v1444_v53 = vld [vmem:[#allocation11 + $0x60] sm:$0xf]  ;;  %v1511_v54 = vld [vmem:[#allocation11 + $0x64] sm:$0xf0] }
  0xf1   :  { %v347_v58 = vpop.f32.mrf.mxu0  ;;  %v367_v29 = vpop.f32.mrf.mxu1 }
  0xf2   :  { %v348_v59 = vadd.f32 %v1828_v28, %v347_v58  ;;  %v368_v31 = vadd.f32 %v1828_v28, %v367_v29  ;;  %v382_v58 = vpop.f32.mrf.mxu2 }
  0xf4   :  { %v417_v61 = vmax.f32 %v348_v59, 0.0  ;;  %v425_v34 = vmax.f32 %v368_v31, 0.0 }
  0xf6   :  { %v445_v62 = vpack.c.bf16 %v417_v61, %v416_v60  ;;  %v449_v35 = vpack.c.bf16 %v425_v34, %v424_v33  ;;  %v381_v61 = vadd.f32 %v1828_v28, %v380_v47  ;;  %v435_v33 = vmax.f32 %v393_v27, 0.0  ;;  %v1505_v27 = vld [vmem:[#allocation11 + $0x34] sm:$0xf0] }
  0xf8   :  { %549 = vmatmul.bf16.gmra.mxu1 %v445_v62  ;;  %v383_v62 = vadd.f32 %v1828_v28, %v382_v58  ;;  %v430_v3 = vmax.f32 %v381_v61, 0.0 }
  0xfa   :  { %v385_v2 = vpop.f32.mrf.mxu2  ;;  %v431_v4 = vmax.f32 %v383_v62, 0.0 }
  0xfb   :  { %v386_v12 = vadd.f32 %v1828_v28, %v385_v2  ;;  %v1509_v2 = vld [vmem:[#allocation11 + $0x54] sm:$0xf0] }
  0xfd   :  { %v432_v18 = vmax.f32 %v386_v12, 0.0 }
 0x102   :  { %v387_v9 = vpop.f32.mrf.mxu2 }
 0x103   :  { %v388_v13 = vadd.f32 %v1828_v28, %v387_v9 }
 0x105   :  { %v433_v19 = vmax.f32 %v388_v13, 0.0 }
 0x107   :  { %v453_v22 = vpack.c.bf16 %v433_v19, %v432_v18 }
 0x108   :  { %554 = vmatmul.bf16.gmra.mxu1 %v446_v8  ;;  %v452_v8 = vpack.c.bf16 %v431_v4, %v430_v3  ;;  %v1508_v4 = vld [vmem:[#allocation11 + $0x54] sm:$0xf] }
 0x118   :  { %559 = vmatmul.bf16.gmra.mxu1 %v447_v16 }
 0x128   :  { %564 = vmatmul.bf16.gmra.mxu1 %v448_v26  ;;  %v391_v26 = vadd.f32 %v1828_v28, %v390_v7 }
 0x12a   :  { %v434_v32 = vmax.f32 %v391_v26, 0.0  ;;  %v1420_v26 = vld [vmem:[#allocation11 + $0x30] sm:$0xf] }
 0x12c   :  { %v454_v37 = vpack.c.bf16 %v435_v33, %v434_v32 }
 0x138   :  { %569 = vmatmul.bf16.gmra.mxu1 %v449_v35  ;;  %v397_v35 = vpop.f32.mrf.mxu3 }
 0x139   :  { %v398_v49 = vadd.f32 %v1828_v28, %v397_v35 }
 0x140   :  { %v400_v47 = vpop.f32.mrf.mxu3 }
 0x141   :  { %v401_v9 = vadd.f32 %v1828_v28, %v400_v47 }
 0x143   :  { %v438_v18 = vmax.f32 %v401_v9, 0.0 }
 0x145   :  { %v535_v42 = vpop.f32.mrf.mxu1 }
 0x146   :  { %v536_v45 = vadd.f32 %v1848_v44, %v535_v42  ;;  %v1454_v42 = vld [vmem:[#allocation11 + $0x78] sm:$0xf0] }
 0x148   :  { %574 = vmatmul.bf16.gmra.mxu1 %v450_v43  ;;  %v615_v51 = vmax.f32 %v536_v45, 0.0  ;;  %v1457_v43 = vor.u32 %v1512_v41, %v1454_v42 }
 0x14a   :  { %1059 = vmatpush.bf16.msrb.mxu0 %v1457_v43 }
 0x14d   :  { %v537_v46 = vpop.f32.mrf.mxu1 }
 0x14e   :  { %v538_v50 = vadd.f32 %v1848_v44, %v537_v46 }
 0x150   :  { %v616_v52 = vmax.f32 %v538_v50, 0.0 }
 0x152   :  { %v647_v55 = vpack.c.bf16 %v616_v52, %v615_v51 }
 0x154   :  { %739 = vmatmul.bf16.vlgmr.msrb.gmra.mxu2 %v647_v55  ;;  %v1445_v55 = vor.u32 %v1511_v54, %v1444_v53  ;;  %v1501_v53 = vld [vmem:[#allocation11 + $0x14] sm:$0xf0] }
 0x155   :  { %v540_v56 = vpop.f32.mrf.mxu1 }
 0x156   :  { %v541_v59 = vadd.f32 %v1848_v44, %v540_v56  ;;  %v436_v56 = vmax.f32 %v396_v48, 0.0  ;;  %971 = vmatpush.bf16.msrb.mxu3 %v1445_v55  ;;  %v1502_v48 = vld [vmem:[#allocation11 + $0x24] sm:$0xf]  ;;  %v1500_v55 = vld [vmem:[#allocation11 + $0x14] sm:$0xf] }
 0x158   :  { %579 = vmatmul.bf16.gmra.mxu1 %v451_v57  ;;  %v617_v0 = vmax.f32 %v541_v59, 0.0  ;;  %v437_v57 = vmax.f32 %v398_v49, 0.0  ;;  %v1510_v59 = vld [vmem:[#allocation11 + $0x64] sm:$0xf]  ;;  %v1414_v49 = vld [vmem:[#allocation11 + $0x28] sm:$0xf0] }
 0x15d   :  { %v542_v60 = vpop.f32.mrf.mxu1 }
 0x15e   :  { %v543_v63 = vadd.f32 %v1848_v44, %v542_v60  ;;  %v1446_v60 = vld [vmem:[#allocation11 + $0x68] sm:$0xf0] }
 0x15f   :  { %v1449_v62 = vor.u32 %v1510_v59, %v1446_v60 }
 0x160   :  { %v618_v1 = vmax.f32 %v543_v63, 0.0  ;;  %v455_v63 = vpack.c.bf16 %v437_v57, %v436_v56  ;;  %v1406_v56 = vld [vmem:[#allocation11 + $0x18] sm:$0xf0] }
 0x161   :  { %1060 = vmatpush.bf16.msrb.mxu0 %v1449_v62  ;;  %v1409_v57 = vor.u32 %v1500_v55, %v1406_v56 }
 0x162   :  { %v648_v5 = vpack.c.bf16 %v618_v1, %v617_v0  ;;  %v402_v0 = vpop.f32.mrf.mxu3  ;;  %v1436_v1 = vld [vmem:[#allocation11 + $0x50] sm:$0xf] }
 0x163   :  { %v1437_v3 = vor.u32 %v1509_v2, %v1436_v1  ;;  %v1498_v2 = vld [vmem:[#allocation11 + $0x4] sm:$0xf] }
 0x164   :  { %744 = vmatmul.bf16.gmra.mxu2 %v648_v5  ;;  %v1438_v5 = vld [vmem:[#allocation11 + $0x58] sm:$0xf0] }
 0x165   :  { %v545_v6 = vpop.f32.mrf.mxu1  ;;  %972 = vmatpush.bf16.msrb.mxu3 %v1437_v3  ;;  %v1398_v3 = vld [vmem:[#allocation11 + $0x8] sm:$0xf0] }
 0x166   :  { %v546_v10 = vadd.f32 %v1848_v44, %v545_v6  ;;  %v1441_v6 = vor.u32 %v1508_v4, %v1438_v5  ;;  %v1401_v5 = vor.u32 %v1498_v2, %v1398_v3 }
 0x168   :  { %584 = vmatmul.bf16.gmra.mxu1 %v452_v8  ;;  %v619_v16 = vmax.f32 %v546_v10, 0.0  ;;  %1061 = vmatpush.bf16.msrb.mxu0 %v1441_v6  ;;  %v403_v10 = vadd.f32 %v1828_v28, %v402_v0  ;;  %v1499_v0 = vld [vmem:[#allocation11 + $0x4] sm:$0xf0] }
 0x16a   :  { %v439_v19 = vmax.f32 %v403_v10, 0.0 }
 0x16d   :  { %v547_v11 = vpop.f32.mrf.mxu1 }
 0x16e   :  { %v548_v14 = vadd.f32 %v1848_v44, %v547_v11 }
 0x170   :  { %v620_v17 = vmax.f32 %v548_v14, 0.0  ;;  %v1428_v14 = vld [vmem:[#allocation11 + $0x40] sm:$0xf] }
 0x172   :  { %v649_v20 = vpack.c.bf16 %v620_v17, %v619_v16  ;;  %v405_v16 = vpop.f32.mrf.mxu3  ;;  %v1429_v17 = vor.u32 %v1507_v15, %v1428_v14  ;;  %v1885_v15 = vld [vmem:[%s2013_s6] ss:$0 sm:$0xff] }
 0x174   :  { %749 = vmatmul.bf16.gmra.mxu2 %v649_v20  ;;  %973 = vmatpush.bf16.msrb.mxu3 %v1429_v17 }
 0x175   :  { %v550_v21 = vpop.f32.mrf.mxu1 }
 0x176   :  { %v551_v24 = vadd.f32 %v1848_v44, %v550_v21  ;;  %v1506_v21 = vld [vmem:[#allocation11 + $0x44] sm:$0xf] }
 0x178   :  { %589 = vmatmul.bf16.gmra.mxu1 %v453_v22  ;;  %v621_v30 = vmax.f32 %v551_v24, 0.0  ;;  %v1430_v22 = vld [vmem:[#allocation11 + $0x48] sm:$0xf0] }
 0x179   :  { %v1433_v24 = vor.u32 %v1506_v21, %v1430_v22 }
 0x17a   :  { %v407_v33 = vpop.f32.mrf.mxu3 }
 0x17b   :  { %1062 = vmatpush.bf16.msrb.mxu0 %v1433_v24 }
 0x17d   :  { %v552_v25 = vpop.f32.mrf.mxu1 }
 0x17e   :  { %v553_v29 = vadd.f32 %v1848_v44, %v552_v25  ;;  %v456_v25 = vpack.c.bf16 %v439_v19, %v438_v18 }
 0x180   :  { %v622_v31 = vmax.f32 %v553_v29, 0.0  ;;  %v1421_v29 = vor.u32 %v1505_v27, %v1420_v26 }
 0x182   :  { %v650_v34 = vpack.c.bf16 %v622_v31, %v621_v30  ;;  %v1504_v30 = vld [vmem:[#allocation11 + $0x34] sm:$0xf]  ;;  %v1422_v31 = vld [vmem:[#allocation11 + $0x38] sm:$0xf0]  ;;  %974 = vmatpush.bf16.msrb.mxu3 %v1421_v29 }
 0x183   :  { %v1425_v32 = vor.u32 %v1504_v30, %v1422_v31 }
 0x184   :  { %754 = vmatmul.bf16.gmra.mxu2 %v650_v34 }
 0x185   :  { %v555_v36 = vpop.f32.mrf.mxu1  ;;  %1063 = vmatpush.bf16.msrb.mxu0 %v1425_v32 }
 0x186   :  { %v556_v45 = vadd.f32 %v1848_v44, %v555_v36  ;;  %v406_v36 = vadd.f32 %v1828_v28, %v405_v16 }
 0x188   :  { %594 = vmatmul.bf16.gmra.mxu1 %v454_v37  ;;  %v623_v51 = vmax.f32 %v556_v45, 0.0  ;;  %v408_v37 = vadd.f32 %v1828_v28, %v407_v33  ;;  %v440_v41 = vmax.f32 %v406_v36, 0.0  ;;  %v1412_v45 = vld [vmem:[#allocation11 + $0x20] sm:$0xf]  ;;  %v1404_v28 = vld [vmem:[#allocation11 + $0x10] sm:$0xf] }
 0x189   :  { %v1405_v54 = vor.u32 %v1501_v53, %v1404_v28 }
 0x18a   :  { %v441_v42 = vmax.f32 %v408_v37, 0.0 }
 0x18d   :  { %v557_v46 = vpop.f32.mrf.mxu1 }
 0x18e   :  { %v558_v50 = vadd.f32 %v1848_v44, %v557_v46  ;;  %v1503_v46 = vld [vmem:[#allocation11 + $0x24] sm:$0xf0] }
 0x18f   :  { %v1413_v47 = vor.u32 %v1503_v46, %v1412_v45 }
 0x190   :  { %v624_v52 = vmax.f32 %v558_v50, 0.0 }
 0x191   :  { %975 = vmatpush.bf16.msrb.mxu3 %v1413_v47 }
 0x192   :  { %v651_v58 = vpack.c.bf16 %v624_v52, %v623_v51  ;;  %v1417_v51 = vor.u32 %v1502_v48, %v1414_v49  ;;  %v457_v52 = vpack.c.bf16 %v441_v42, %v440_v41 }
 0x194   :  { %759 = vmatmul.bf16.gmra.mxu2 %v651_v58  ;;  %1064 = vmatpush.bf16.msrb.mxu0 %v1417_v51 }
 0x195   :  { %v560_v61 = vpop.f32.mrf.mxu1  ;;  %976 = vmatpush.bf16.msrb.mxu3 %v1405_v54 }
 0x196   :  { %v561_v7 = vadd.f32 %v1848_v44, %v560_v61 }
 0x198   :  { %599 = vmatmul.bf16.gmra.mxu1 %v455_v63  ;;  %v625_v12 = vmax.f32 %v561_v7, 0.0  ;;  %1065 = vmatpush.bf16.msrb.mxu0 %v1409_v57  ;;  %v1396_v63 = vld [vmem:[#allocation11] sm:$0xf] }
 0x199   :  { %v1397_v1 = vor.u32 %v1499_v0, %v1396_v63 }
 0x19b   :  { %977 = vmatpush.bf16.msrb.mxu3 %v1397_v1 }
 0x19c   :  { %1066 = vmatpush.bf16.msrb.mxu0 %v1401_v5 }
 0x19d   :  { %v562_v8 = vpop.f32.mrf.mxu1 }
 0x19e   :  { %v563_v11 = vadd.f32 %v1848_v44, %v562_v8 }
 0x1a0   :  { %v626_v13 = vmax.f32 %v563_v11, 0.0 }
 0x1a2   :  { %v652_v20 = vpack.c.bf16 %v626_v13, %v625_v12 }
 0x1a4   :  { %764 = vmatmul.bf16.gmra.mxu2 %v652_v20 }
 0x1a5   :  { %v565_v23 = vpop.f32.mrf.mxu1 }
 0x1a6   :  { %v566_v34 = vadd.f32 %v1848_v44, %v565_v23 }
 0x1a8   :  { %604 = vmatmul.bf16.gmra.mxu1 %v456_v25  ;;  %v627_v39 = vmax.f32 %v566_v34, 0.0 }
 0x1ad   :  { %v567_v35 = vpop.f32.mrf.mxu1 }
 0x1ae   :  { %v568_v38 = vadd.f32 %v1848_v44, %v567_v35 }
 0x1b0   :  { %v628_v40 = vmax.f32 %v568_v38, 0.0 }
 0x1b2   :  { %v653_v43 = vpack.c.bf16 %v628_v40, %v627_v39 }
 0x1b4   :  { %769 = vmatmul.bf16.gmra.mxu2 %v653_v43 }
 0x1b5   :  { %v570_v50 = vpop.f32.mrf.mxu1 }
 0x1b6   :  { %v571_v58 = vadd.f32 %v1848_v44, %v570_v50 }
 0x1b8   :  { %609 = vmatmul.bf16.gmra.mxu1 %v457_v52  ;;  %v629_v61 = vmax.f32 %v571_v58, 0.0 }
 0x1bd   :  { %v572_v59 = vpop.f32.mrf.mxu1 }
 0x1be   :  { %v573_v60 = vadd.f32 %v1848_v44, %v572_v59 }
 0x1c0   :  { %v630_v62 = vmax.f32 %v573_v60, 0.0 }
 0x1c2   :  { %v654_v4 = vpack.c.bf16 %v630_v62, %v629_v61 }
 0x1c4   :  { %774 = vmatmul.bf16.gmra.mxu2 %v654_v4 }
 0x1c5   :  { %v575_v6 = vpop.f32.mrf.mxu1 }
 0x1c6   :  { %v576_v7 = vadd.f32 %v1848_v44, %v575_v6 }
 0x1c8   :  { %v631_v10 = vmax.f32 %v576_v7, 0.0 }
 0x1cd   :  { %v577_v8 = vpop.f32.mrf.mxu1 }
 0x1ce   :  { %v578_v9 = vadd.f32 %v1848_v44, %v577_v8 }
 0x1d0   :  { %v632_v11 = vmax.f32 %v578_v9, 0.0 }
 0x1d2   :  { %v655_v12 = vpack.c.bf16 %v632_v11, %v631_v10 }
 0x1d4   :  { %779 = vmatmul.bf16.gmra.mxu2 %v655_v12 }
 0x1d5   :  { %v580_v13 = vpop.f32.mrf.mxu1 }
 0x1d6   :  { %v581_v16 = vadd.f32 %v1848_v44, %v580_v13 }
 0x1d7   :  { %v740_v14 = vpop.f32.mrf.mxu2 }
 0x1d8   :  { %v741_v18 = vadd.f32 %v1885_v15, %v740_v14  ;;  %v633_v21 = vmax.f32 %v581_v16, 0.0 }
 0x1da   :  { %v820_v24 = vmax.f32 %v741_v18, 0.0 }
 0x1dd   :  { %v582_v17 = vpop.f32.mrf.mxu1 }
 0x1de   :  { %v583_v19 = vadd.f32 %v1848_v44, %v582_v17 }
 0x1df   :  { %v742_v20 = vpop.f32.mrf.mxu2 }
 0x1e0   :  { %v634_v22 = vmax.f32 %v583_v19, 0.0  ;;  %v743_v23 = vadd.f32 %v1885_v15, %v742_v20 }
 0x1e2   :  { %v656_v25 = vpack.c.bf16 %v634_v22, %v633_v21  ;;  %v821_v26 = vmax.f32 %v743_v23, 0.0 }
 0x1e4   :  { %784 = vmatmul.bf16.gmra.mxu2 %v656_v25  ;;  %v852_v27 = vpack.c.bf16 %v821_v26, %v820_v24 }
 0x1e5   :  { %v585_v29 = vpop.f32.mrf.mxu1 }
 0x1e6   :  { %978 = vmatmul.bf16.vlgmr.msrb.gmra.mxu3 %v852_v27  ;;  %1067 = vmatmul.bf16.vlgmr.msrb.gmra.mxu0 %v852_v27  ;;  %v586_v31 = vadd.f32 %v1848_v44, %v585_v29 }
 0x1e7   :  { %v745_v30 = vpop.f32.mrf.mxu2 }
 0x1e8   :  { %v746_v33 = vadd.f32 %v1885_v15, %v745_v30  ;;  %v635_v36 = vmax.f32 %v586_v31, 0.0 }
 0x1ea   :  { %v822_v39 = vmax.f32 %v746_v33, 0.0 }
 0x1ed   :  { %v587_v32 = vpop.f32.mrf.mxu1 }
 0x1ee   :  { %v588_v34 = vadd.f32 %v1848_v44, %v587_v32 }
 0x1ef   :  { %v747_v35 = vpop.f32.mrf.mxu2 }
 0x1f0   :  { %v636_v37 = vmax.f32 %v588_v34, 0.0  ;;  %v748_v38 = vadd.f32 %v1885_v15, %v747_v35 }
 0x1f2   :  { %v657_v40 = vpack.c.bf16 %v636_v37, %v635_v36  ;;  %v823_v41 = vmax.f32 %v748_v38, 0.0 }
 0x1f4   :  { %789 = vmatmul.bf16.gmra.mxu2 %v657_v40  ;;  %v853_v42 = vpack.c.bf16 %v823_v41, %v822_v39 }
 0x1f5   :  { %v590_v43 = vpop.f32.mrf.mxu1 }
 0x1f6   :  { %983 = vmatmul.bf16.gmra.mxu3 %v853_v42  ;;  %1072 = vmatmul.bf16.gmra.mxu0 %v853_v42  ;;  %v591_v46 = vadd.f32 %v1848_v44, %v590_v43 }
 0x1f7   :  { %v750_v45 = vpop.f32.mrf.mxu2 }
 0x1f8   :  { %v751_v48 = vadd.f32 %v1885_v15, %v750_v45  ;;  %v637_v51 = vmax.f32 %v591_v46, 0.0 }
 0x1fa   :  { %v824_v53 = vmax.f32 %v751_v48, 0.0 }
 0x1fd   :  { %v592_v47 = vpop.f32.mrf.mxu1 }
 0x1fe   :  { %v593_v49 = vadd.f32 %v1848_v44, %v592_v47 }
 0x1ff   :  { %v752_v50 = vpop.f32.mrf.mxu2 }
 0x200   :  { %v638_v52 = vmax.f32 %v593_v49, 0.0  ;;  %v753_v28 = vadd.f32 %v1885_v15, %v752_v50 }
 0x202   :  { %v658_v54 = vpack.c.bf16 %v638_v52, %v637_v51  ;;  %v825_v55 = vmax.f32 %v753_v28, 0.0 }
 0x204   :  { %794 = vmatmul.bf16.gmra.mxu2 %v658_v54  ;;  %v854_v56 = vpack.c.bf16 %v825_v55, %v824_v53 }
 0x205   :  { %v595_v57 = vpop.f32.mrf.mxu1 }
 0x206   :  { %988 = vmatmul.bf16.gmra.mxu3 %v854_v56  ;;  %1077 = vmatmul.bf16.gmra.mxu0 %v854_v56  ;;  %v596_v59 = vadd.f32 %v1848_v44, %v595_v57 }
 0x207   :  { %v755_v58 = vpop.f32.mrf.mxu2 }
 0x208   :  { %v756_v61 = vadd.f32 %v1885_v15, %v755_v58  ;;  %v639_v0 = vmax.f32 %v596_v59, 0.0  ;;  %v884_v58 = vld [vmem:[%s2015_s8] sm:$0x3]  ;;  %s1742_s8 = smov [#allocation13]  }
 0x209   :  { %s1216_s20 = sshll.u32 %s1742_s8, 4  ;;  %s1217_s20 = int_to_ptr.vmem [resolvable:$true] %s1216_s20 }
 0x20a   :  { %v826_v3 = vmax.f32 %v756_v61, 0.0 }
 0x20d   :  { %v597_v60 = vpop.f32.mrf.mxu1 }
 0x20e   :  { %v598_v62 = vadd.f32 %v1848_v44, %v597_v60 }
 0x20f   :  { %v757_v63 = vpop.f32.mrf.mxu2 }
 0x210   :  { %v640_v1 = vmax.f32 %v598_v62, 0.0  ;;  %v758_v2 = vadd.f32 %v1885_v15, %v757_v63  ;;  %v1922_v62 = vperm.slane %v884_v58, 1 }
 0x212   :  { %v659_v4 = vpack.c.bf16 %v640_v1, %v639_v0  ;;  %v827_v5 = vmax.f32 %v758_v2, 0.0 }
 0x214   :  { %799 = vmatmul.bf16.gmra.mxu2 %v659_v4  ;;  %v855_v6 = vpack.c.bf16 %v827_v5, %v826_v3  ;;  %v1925_v4 = vperm.slane %v884_v58, 0 }
 0x215   :  { %v600_v7 = vpop.f32.mrf.mxu1 }
 0x216   :  { %993 = vmatmul.bf16.gmra.mxu3 %v855_v6  ;;  %1082 = vmatmul.bf16.gmra.mxu0 %v855_v6  ;;  %v601_v9 = vadd.f32 %v1848_v44, %v600_v7 }
 0x217   :  { %v760_v8 = vpop.f32.mrf.mxu2 }
 0x218   :  { %v761_v11 = vadd.f32 %v1885_v15, %v760_v8  ;;  %v641_v14 = vmax.f32 %v601_v9, 0.0 }
 0x21a   :  { %v828_v18 = vmax.f32 %v761_v11, 0.0 }
 0x21d   :  { %v602_v10 = vpop.f32.mrf.mxu1 }
 0x21e   :  { %v603_v12 = vadd.f32 %v1848_v44, %v602_v10 }
 0x21f   :  { %v762_v13 = vpop.f32.mrf.mxu2 }
 0x220   :  { %v642_v16 = vmax.f32 %v603_v12, 0.0  ;;  %v763_v17 = vadd.f32 %v1885_v15, %v762_v13 }
 0x222   :  { %v660_v19 = vpack.c.bf16 %v642_v16, %v641_v14  ;;  %v829_v20 = vmax.f32 %v763_v17, 0.0 }
 0x224   :  { %804 = vmatmul.bf16.gmra.mxu2 %v660_v19  ;;  %v856_v21 = vpack.c.bf16 %v829_v20, %v828_v18 }
 0x225   :  { %v605_v22 = vpop.f32.mrf.mxu1 }
 0x226   :  { %998 = vmatmul.bf16.gmra.mxu3 %v856_v21  ;;  %1087 = vmatmul.bf16.gmra.mxu0 %v856_v21  ;;  %v606_v24 = vadd.f32 %v1848_v44, %v605_v22 }
 0x227   :  { %v765_v23 = vpop.f32.mrf.mxu2 }
 0x228   :  { %v766_v26 = vadd.f32 %v1885_v15, %v765_v23  ;;  %v643_v30 = vmax.f32 %v606_v24, 0.0 }
 0x22a   :  { %v830_v33 = vmax.f32 %v766_v26, 0.0 }
 0x22d   :  { %v607_v25 = vpop.f32.mrf.mxu1 }
 0x22e   :  { %v608_v27 = vadd.f32 %v1848_v44, %v607_v25 }
 0x22f   :  { %v767_v29 = vpop.f32.mrf.mxu2 }
 0x230   :  { %v644_v31 = vmax.f32 %v608_v27, 0.0  ;;  %v768_v32 = vadd.f32 %v1885_v15, %v767_v29 }
 0x232   :  { %v661_v34 = vpack.c.bf16 %v644_v31, %v643_v30  ;;  %v831_v35 = vmax.f32 %v768_v32, 0.0 }
 0x234   :  { %809 = vmatmul.bf16.gmra.mxu2 %v661_v34  ;;  %v857_v36 = vpack.c.bf16 %v831_v35, %v830_v33 }
 0x235   :  { %v610_v37 = vpop.f32.mrf.mxu1 }
 0x236   :  { %1003 = vmatmul.bf16.gmra.mxu3 %v857_v36  ;;  %1092 = vmatmul.bf16.gmra.mxu0 %v857_v36  ;;  %v611_v39 = vadd.f32 %v1848_v44, %v610_v37 }
 0x237   :  { %v770_v38 = vpop.f32.mrf.mxu2 }
 0x238   :  { %v771_v41 = vadd.f32 %v1885_v15, %v770_v38  ;;  %v645_v45 = vmax.f32 %v611_v39, 0.0 }
 0x23a   :  { %v832_v48 = vmax.f32 %v771_v41, 0.0 }
 0x23d   :  { %v612_v40 = vpop.f32.mrf.mxu1 }
 0x23e   :  { %v613_v42 = vadd.f32 %v1848_v44, %v612_v40 }
 0x23f   :  { %v772_v43 = vpop.f32.mrf.mxu2 }
 0x240   :  { %v646_v46 = vmax.f32 %v613_v42, 0.0  ;;  %v773_v47 = vadd.f32 %v1885_v15, %v772_v43 }
 0x242   :  { %v662_v49 = vpack.c.bf16 %v646_v46, %v645_v45  ;;  %v833_v50 = vmax.f32 %v773_v47, 0.0 }
 0x244   :  { %814 = vmatmul.bf16.gmra.mxu2 %v662_v49  ;;  %v858_v51 = vpack.c.bf16 %v833_v50, %v832_v48 }
 0x246   :  { %1008 = vmatmul.bf16.gmra.mxu3 %v858_v51  ;;  %1097 = vmatmul.bf16.gmra.mxu0 %v858_v51 }
 0x247   :  { %v775_v52 = vpop.f32.mrf.mxu2 }
 0x248   :  { %v776_v28 = vadd.f32 %v1885_v15, %v775_v52 }
 0x24a   :  { %v834_v55 = vmax.f32 %v776_v28, 0.0 }
 0x24f   :  { %v777_v53 = vpop.f32.mrf.mxu2 }
 0x250   :  { %v778_v54 = vadd.f32 %v1885_v15, %v777_v53 }
 0x252   :  { %v835_v44 = vmax.f32 %v778_v54, 0.0 }
 0x254   :  { %v859_v56 = vpack.c.bf16 %v835_v44, %v834_v55 }
 0x256   :  { %1013 = vmatmul.bf16.gmra.mxu3 %v859_v56  ;;  %1102 = vmatmul.bf16.gmra.mxu0 %v859_v56 }
 0x257   :  { %v780_v57 = vpop.f32.mrf.mxu2 }
 0x258   :  { %v781_v59 = vadd.f32 %v1885_v15, %v780_v57 }
 0x25a   :  { %v836_v63 = vmax.f32 %v781_v59, 0.0 }
 0x25f   :  { %v782_v60 = vpop.f32.mrf.mxu2 }
 0x260   :  { %v783_v61 = vadd.f32 %v1885_v15, %v782_v60 }
 0x262   :  { %v837_v0 = vmax.f32 %v783_v61, 0.0 }
 0x263   :  { %v1068_v1 = vpop.f32.mrf.mxu0 }
 0x264   :  { %v860_v2 = vpack.c.bf16 %v837_v0, %v836_v63  ;;  %v1069_v3 = vadd.f32 %v1068_v1, %v1922_v62 }
 0x266   :  { %1149 = vst [vmem:[#allocation13 + $0x8] sm:$0xff] %v1069_v3  ;;  %1018 = vmatmul.bf16.gmra.mxu3 %v860_v2  ;;  %1107 = vmatmul.bf16.gmra.mxu0 %v860_v2 }
 0x267   :  { %v785_v5 = vpop.f32.mrf.mxu2 }
 0x268   :  { %v786_v10 = vadd.f32 %v1885_v15, %v785_v5 }
 0x269   :  { %v979_v6 = vpop.f32.mrf.mxu3 }
 0x26a   :  { %v980_v7 = vadd.f32 %v979_v6, %v1925_v4  ;;  %v838_v14 = vmax.f32 %v786_v10, 0.0 }
 0x26b   :  { %v1070_v8 = vpop.f32.mrf.mxu0 }
 0x26c   :  { %1148 = vst [vmem:[#allocation13] sm:$0xff] %v980_v7  ;;  %v1071_v9 = vadd.f32 %v1070_v8, %v1922_v62 }
 0x26e   :  { %1151 = vst [vmem:[#allocation13 + $0x18] sm:$0xff] %v1071_v9 }
 0x26f   :  { %v787_v11 = vpop.f32.mrf.mxu2 }
 0x270   :  { %v788_v12 = vadd.f32 %v1885_v15, %v787_v11 }
 0x271   :  { %v981_v13 = vpop.f32.mrf.mxu3 }
 0x272   :  { %v839_v16 = vmax.f32 %v788_v12, 0.0  ;;  %v982_v17 = vadd.f32 %v981_v13, %v1925_v4 }
 0x273   :  { %v1073_v18 = vpop.f32.mrf.mxu0 }
 0x274   :  { %v861_v19 = vpack.c.bf16 %v839_v16, %v838_v14  ;;  %1150 = vst [vmem:[#allocation13 + $0x10] sm:$0xff] %v982_v17  ;;  %v1074_v20 = vadd.f32 %v1073_v18, %v1922_v62 }
 0x276   :  { %1153 = vst [vmem:[#allocation13 + $0x28] sm:$0xff] %v1074_v20  ;;  %1023 = vmatmul.bf16.gmra.mxu3 %v861_v19  ;;  %1112 = vmatmul.bf16.gmra.mxu0 %v861_v19 }
 0x277   :  { %v790_v21 = vpop.f32.mrf.mxu2 }
 0x278   :  { %v791_v26 = vadd.f32 %v1885_v15, %v790_v21 }
 0x279   :  { %v984_v22 = vpop.f32.mrf.mxu3 }
 0x27a   :  { %v985_v23 = vadd.f32 %v984_v22, %v1925_v4  ;;  %v840_v31 = vmax.f32 %v791_v26, 0.0 }
 0x27b   :  { %v1075_v24 = vpop.f32.mrf.mxu0 }
 0x27c   :  { %1152 = vst [vmem:[#allocation13 + $0x20] sm:$0xff] %v985_v23  ;;  %v1076_v25 = vadd.f32 %v1075_v24, %v1922_v62 }
 0x27e   :  { %1155 = vst [vmem:[#allocation13 + $0x38] sm:$0xff] %v1076_v25 }
 0x27f   :  { %v792_v27 = vpop.f32.mrf.mxu2 }
 0x280   :  { %v793_v29 = vadd.f32 %v1885_v15, %v792_v27 }
 0x281   :  { %v986_v30 = vpop.f32.mrf.mxu3 }
 0x282   :  { %v841_v32 = vmax.f32 %v793_v29, 0.0  ;;  %v987_v33 = vadd.f32 %v986_v30, %v1925_v4 }
 0x283   :  { %v1078_v34 = vpop.f32.mrf.mxu0 }
 0x284   :  { %v862_v35 = vpack.c.bf16 %v841_v32, %v840_v31  ;;  %1154 = vst [vmem:[#allocation13 + $0x30] sm:$0xff] %v987_v33  ;;  %v1079_v36 = vadd.f32 %v1078_v34, %v1922_v62 }
 0x286   :  { %1157 = vst [vmem:[#allocation13 + $0x48] sm:$0xff] %v1079_v36  ;;  %1028 = vmatmul.bf16.gmra.mxu3 %v862_v35  ;;  %1117 = vmatmul.bf16.gmra.mxu0 %v862_v35 }
 0x287   :  { %v795_v37 = vpop.f32.mrf.mxu2 }
 0x288   :  { %v796_v42 = vadd.f32 %v1885_v15, %v795_v37 }
 0x289   :  { %v989_v38 = vpop.f32.mrf.mxu3 }
 0x28a   :  { %v990_v39 = vadd.f32 %v989_v38, %v1925_v4  ;;  %v842_v47 = vmax.f32 %v796_v42, 0.0 }
 0x28b   :  { %v1080_v40 = vpop.f32.mrf.mxu0 }
 0x28c   :  { %1156 = vst [vmem:[#allocation13 + $0x40] sm:$0xff] %v990_v39  ;;  %v1081_v41 = vadd.f32 %v1080_v40, %v1922_v62 }
 0x28e   :  { %1159 = vst [vmem:[#allocation13 + $0x58] sm:$0xff] %v1081_v41 }
 0x28f   :  { %v797_v43 = vpop.f32.mrf.mxu2 }
 0x290   :  { %v798_v45 = vadd.f32 %v1885_v15, %v797_v43 }
 0x291   :  { %v991_v46 = vpop.f32.mrf.mxu3 }
 0x292   :  { %v843_v48 = vmax.f32 %v798_v45, 0.0  ;;  %v992_v49 = vadd.f32 %v991_v46, %v1925_v4 }
 0x293   :  { %v1083_v50 = vpop.f32.mrf.mxu0 }
 0x294   :  { %v863_v51 = vpack.c.bf16 %v843_v48, %v842_v47  ;;  %1158 = vst [vmem:[#allocation13 + $0x50] sm:$0xff] %v992_v49  ;;  %v1084_v52 = vadd.f32 %v1083_v50, %v1922_v62 }
 0x296   :  { %1161 = vst [vmem:[#allocation13 + $0x68] sm:$0xff] %v1084_v52  ;;  %1033 = vmatmul.bf16.gmra.mxu3 %v863_v51  ;;  %1122 = vmatmul.bf16.gmra.mxu0 %v863_v51 }
 0x297   :  { %v800_v28 = vpop.f32.mrf.mxu2 }
 0x298   :  { %v801_v56 = vadd.f32 %v1885_v15, %v800_v28 }
 0x299   :  { %v994_v53 = vpop.f32.mrf.mxu3 }
 0x29a   :  { %v995_v54 = vadd.f32 %v994_v53, %v1925_v4  ;;  %v844_v60 = vmax.f32 %v801_v56, 0.0 }
 0x29b   :  { %v1085_v55 = vpop.f32.mrf.mxu0 }
 0x29c   :  { %1160 = vst [vmem:[#allocation13 + $0x60] sm:$0xff] %v995_v54  ;;  %v1086_v44 = vadd.f32 %v1085_v55, %v1922_v62 }
 0x29e   :  { %1163 = vst [vmem:[#allocation13 + $0x78] sm:$0xff] %v1086_v44 }
 0x29f   :  { %v802_v57 = vpop.f32.mrf.mxu2 }
 0x2a0   :  { %v803_v58 = vadd.f32 %v1885_v15, %v802_v57 }
 0x2a1   :  { %v996_v59 = vpop.f32.mrf.mxu3 }
 0x2a2   :  { %v845_v61 = vmax.f32 %v803_v58, 0.0  ;;  %v997_v63 = vadd.f32 %v996_v59, %v1925_v4 }
 0x2a3   :  { %v1088_v0 = vpop.f32.mrf.mxu0 }
 0x2a4   :  { %v864_v1 = vpack.c.bf16 %v845_v61, %v844_v60  ;;  %1162 = vst [vmem:[#allocation13 + $0x70] sm:$0xff] %v997_v63  ;;  %v1089_v2 = vadd.f32 %v1088_v0, %v1922_v62 }
 0x2a6   :  { %1165 = vst [vmem:[#allocation13 + $0x88] sm:$0xff] %v1089_v2  ;;  %1038 = vmatmul.bf16.gmra.mxu3 %v864_v1  ;;  %1127 = vmatmul.bf16.gmra.mxu0 %v864_v1 }
 0x2a7   :  { %v805_v3 = vpop.f32.mrf.mxu2 }
 0x2a8   :  { %v806_v9 = vadd.f32 %v1885_v15, %v805_v3 }
 0x2a9   :  { %v999_v5 = vpop.f32.mrf.mxu3 }
 0x2aa   :  { %v1000_v6 = vadd.f32 %v999_v5, %v1925_v4  ;;  %v846_v13 = vmax.f32 %v806_v9, 0.0 }
 0x2ab   :  { %v1090_v7 = vpop.f32.mrf.mxu0 }
 0x2ac   :  { %1164 = vst [vmem:[#allocation13 + $0x80] sm:$0xff] %v1000_v6  ;;  %v1091_v8 = vadd.f32 %v1090_v7, %v1922_v62 }
 0x2ae   :  { %1167 = vst [vmem:[#allocation13 + $0x98] sm:$0xff] %v1091_v8 }
 0x2af   :  { %v807_v10 = vpop.f32.mrf.mxu2 }
 0x2b0   :  { %v808_v11 = vadd.f32 %v1885_v15, %v807_v10 }
 0x2b1   :  { %v1001_v12 = vpop.f32.mrf.mxu3 }
 0x2b2   :  { %v847_v14 = vmax.f32 %v808_v11, 0.0  ;;  %v1002_v16 = vadd.f32 %v1001_v12, %v1925_v4 }
 0x2b3   :  { %v1093_v17 = vpop.f32.mrf.mxu0 }
 0x2b4   :  { %v865_v18 = vpack.c.bf16 %v847_v14, %v846_v13  ;;  %1166 = vst [vmem:[#allocation13 + $0x90] sm:$0xff] %v1002_v16  ;;  %v1094_v19 = vadd.f32 %v1093_v17, %v1922_v62 }
 0x2b6   :  { %1169 = vst [vmem:[#allocation13 + $0xa8] sm:$0xff] %v1094_v19  ;;  %1043 = vmatmul.bf16.gmra.mxu3 %v865_v18  ;;  %1132 = vmatmul.bf16.gmra.mxu0 %v865_v18 }
 0x2b7   :  { %v810_v20 = vpop.f32.mrf.mxu2 }
 0x2b8   :  { %v811_v25 = vadd.f32 %v1885_v15, %v810_v20 }
 0x2b9   :  { %v1004_v21 = vpop.f32.mrf.mxu3 }
 0x2ba   :  { %v1005_v22 = vadd.f32 %v1004_v21, %v1925_v4  ;;  %v848_v30 = vmax.f32 %v811_v25, 0.0 }
 0x2bb   :  { %v1095_v23 = vpop.f32.mrf.mxu0 }
 0x2bc   :  { %1168 = vst [vmem:[#allocation13 + $0xa0] sm:$0xff] %v1005_v22  ;;  %v1096_v24 = vadd.f32 %v1095_v23, %v1922_v62 }
 0x2be   :  { %1171 = vst [vmem:[#allocation13 + $0xb8] sm:$0xff] %v1096_v24 }
 0x2bf   :  { %v812_v26 = vpop.f32.mrf.mxu2 }
 0x2c0   :  { %v813_v27 = vadd.f32 %v1885_v15, %v812_v26 }
 0x2c1   :  { %v1006_v29 = vpop.f32.mrf.mxu3 }
 0x2c2   :  { %v849_v31 = vmax.f32 %v813_v27, 0.0  ;;  %v1007_v32 = vadd.f32 %v1006_v29, %v1925_v4 }
 0x2c3   :  { %v1098_v33 = vpop.f32.mrf.mxu0 }
 0x2c4   :  { %v866_v34 = vpack.c.bf16 %v849_v31, %v848_v30  ;;  %1170 = vst [vmem:[#allocation13 + $0xb0] sm:$0xff] %v1007_v32  ;;  %v1099_v35 = vadd.f32 %v1098_v33, %v1922_v62 }
 0x2c6   :  { %1173 = vst [vmem:[#allocation13 + $0xc8] sm:$0xff] %v1099_v35  ;;  %1048 = vmatmul.bf16.gmra.mxu3 %v866_v34  ;;  %1137 = vmatmul.bf16.gmra.mxu0 %v866_v34 }
 0x2c7   :  { %v815_v36 = vpop.f32.mrf.mxu2 }
 0x2c8   :  { %v816_v41 = vadd.f32 %v1885_v15, %v815_v36 }
 0x2c9   :  { %v1009_v37 = vpop.f32.mrf.mxu3 }
 0x2ca   :  { %v1010_v38 = vadd.f32 %v1009_v37, %v1925_v4  ;;  %v850_v46 = vmax.f32 %v816_v41, 0.0 }
 0x2cb   :  { %v1100_v39 = vpop.f32.mrf.mxu0 }
 0x2cc   :  { %1172 = vst [vmem:[#allocation13 + $0xc0] sm:$0xff] %v1010_v38  ;;  %v1101_v40 = vadd.f32 %v1100_v39, %v1922_v62 }
 0x2ce   :  { %1175 = vst [vmem:[#allocation13 + $0xd8] sm:$0xff] %v1101_v40 }
 0x2cf   :  { %v817_v42 = vpop.f32.mrf.mxu2 }
 0x2d0   :  { %v818_v43 = vadd.f32 %v1885_v15, %v817_v42 }
 0x2d1   :  { %v1011_v45 = vpop.f32.mrf.mxu3 }
 0x2d2   :  { %v851_v47 = vmax.f32 %v818_v43, 0.0  ;;  %v1012_v48 = vadd.f32 %v1011_v45, %v1925_v4 }
 0x2d3   :  { %v1103_v49 = vpop.f32.mrf.mxu0 }
 0x2d4   :  { %v867_v50 = vpack.c.bf16 %v851_v47, %v850_v46  ;;  %1174 = vst [vmem:[#allocation13 + $0xd0] sm:$0xff] %v1012_v48  ;;  %v1104_v51 = vadd.f32 %v1103_v49, %v1922_v62 }
 0x2d6   :  { %1177 = vst [vmem:[#allocation13 + $0xe8] sm:$0xff] %v1104_v51  ;;  %1053 = vmatmul.bf16.gmra.mxu3 %v867_v50  ;;  %1142 = vmatmul.bf16.gmra.mxu0 %v867_v50 }
 0x2d9   :  { %v1014_v52 = vpop.f32.mrf.mxu3 }
 0x2da   :  { %v1015_v28 = vadd.f32 %v1014_v52, %v1925_v4 }
 0x2db   :  { %v1105_v53 = vpop.f32.mrf.mxu0 }
 0x2dc   :  { %1176 = vst [vmem:[#allocation13 + $0xe0] sm:$0xff] %v1015_v28  ;;  %v1106_v15 = vadd.f32 %v1105_v53, %v1922_v62 }
 0x2de   :  { %1179 = vst [vmem:[#allocation13 + $0xf8] sm:$0xff] %v1106_v15 }
 0x2e1   :  { %v1016_v54 = vpop.f32.mrf.mxu3 }
 0x2e2   :  { %v1017_v55 = vadd.f32 %v1016_v54, %v1925_v4 }
 0x2e3   :  { %v1108_v44 = vpop.f32.mrf.mxu0 }
 0x2e4   :  { %1178 = vst [vmem:[#allocation13 + $0xf0] sm:$0xff] %v1017_v55  ;;  %v1109_v56 = vadd.f32 %v1108_v44, %v1922_v62 }
 0x2e6   :  { %1181 = vst [vmem:[#allocation13 + $0x108] sm:$0xff] %v1109_v56 }
 0x2e9   :  { %v1019_v57 = vpop.f32.mrf.mxu3 }
 0x2ea   :  { %v1020_v58 = vadd.f32 %v1019_v57, %v1925_v4 }
 0x2eb   :  { %v1110_v59 = vpop.f32.mrf.mxu0 }
 0x2ec   :  { %1180 = vst [vmem:[#allocation13 + $0x100] sm:$0xff] %v1020_v58  ;;  %v1111_v60 = vadd.f32 %v1110_v59, %v1922_v62 }
 0x2ee   :  { %1183 = vst [vmem:[#allocation13 + $0x118] sm:$0xff] %v1111_v60 }
 0x2f1   :  { %v1021_v61 = vpop.f32.mrf.mxu3 }
 0x2f2   :  { %v1022_v63 = vadd.f32 %v1021_v61, %v1925_v4 }
 0x2f3   :  { %v1113_v0 = vpop.f32.mrf.mxu0 }
 0x2f4   :  { %1182 = vst [vmem:[#allocation13 + $0x110] sm:$0xff] %v1022_v63  ;;  %v1114_v1 = vadd.f32 %v1113_v0, %v1922_v62 }
 0x2f6   :  { %1185 = vst [vmem:[#allocation13 + $0x128] sm:$0xff] %v1114_v1 }
 0x2f9   :  { %v1024_v2 = vpop.f32.mrf.mxu3 }
 0x2fa   :  { %v1025_v3 = vadd.f32 %v1024_v2, %v1925_v4 }
 0x2fb   :  { %v1115_v5 = vpop.f32.mrf.mxu0 }
 0x2fc   :  { %1184 = vst [vmem:[#allocation13 + $0x120] sm:$0xff] %v1025_v3  ;;  %v1116_v6 = vadd.f32 %v1115_v5, %v1922_v62 }
 0x2fe   :  { %1187 = vst [vmem:[#allocation13 + $0x138] sm:$0xff] %v1116_v6 }
 0x301   :  { %v1026_v7 = vpop.f32.mrf.mxu3 }
 0x302   :  { %v1027_v8 = vadd.f32 %v1026_v7, %v1925_v4 }
 0x303   :  { %v1118_v9 = vpop.f32.mrf.mxu0 }
 0x304   :  { %1186 = vst [vmem:[#allocation13 + $0x130] sm:$0xff] %v1027_v8  ;;  %v1119_v10 = vadd.f32 %v1118_v9, %v1922_v62 }
 0x306   :  { %1189 = vst [vmem:[#allocation13 + $0x148] sm:$0xff] %v1119_v10 }
 0x309   :  { %v1029_v11 = vpop.f32.mrf.mxu3 }
 0x30a   :  { %v1030_v12 = vadd.f32 %v1029_v11, %v1925_v4 }
 0x30b   :  { %v1120_v13 = vpop.f32.mrf.mxu0 }
 0x30c   :  { %1188 = vst [vmem:[#allocation13 + $0x140] sm:$0xff] %v1030_v12  ;;  %v1121_v14 = vadd.f32 %v1120_v13, %v1922_v62 }
 0x30e   :  { %1191 = vst [vmem:[#allocation13 + $0x158] sm:$0xff] %v1121_v14 }
 0x311   :  { %v1031_v16 = vpop.f32.mrf.mxu3 }
 0x312   :  { %v1032_v17 = vadd.f32 %v1031_v16, %v1925_v4 }
 0x313   :  { %v1123_v18 = vpop.f32.mrf.mxu0 }
 0x314   :  { %1190 = vst [vmem:[#allocation13 + $0x150] sm:$0xff] %v1032_v17  ;;  %v1124_v19 = vadd.f32 %v1123_v18, %v1922_v62 }
 0x316   :  { %1193 = vst [vmem:[#allocation13 + $0x168] sm:$0xff] %v1124_v19 }
 0x319   :  { %v1034_v20 = vpop.f32.mrf.mxu3 }
 0x31a   :  { %v1035_v21 = vadd.f32 %v1034_v20, %v1925_v4 }
 0x31b   :  { %v1125_v22 = vpop.f32.mrf.mxu0 }
 0x31c   :  { %1192 = vst [vmem:[#allocation13 + $0x160] sm:$0xff] %v1035_v21  ;;  %v1126_v23 = vadd.f32 %v1125_v22, %v1922_v62 }
 0x31e   :  { %1195 = vst [vmem:[#allocation13 + $0x178] sm:$0xff] %v1126_v23 }
 0x321   :  { %v1036_v24 = vpop.f32.mrf.mxu3 }
 0x322   :  { %v1037_v25 = vadd.f32 %v1036_v24, %v1925_v4 }
 0x323   :  { %v1128_v26 = vpop.f32.mrf.mxu0 }
 0x324   :  { %1194 = vst [vmem:[#allocation13 + $0x170] sm:$0xff] %v1037_v25  ;;  %v1129_v27 = vadd.f32 %v1128_v26, %v1922_v62 }
 0x326   :  { %1197 = vst [vmem:[#allocation13 + $0x188] sm:$0xff] %v1129_v27 }
 0x329   :  { %v1039_v29 = vpop.f32.mrf.mxu3 }
 0x32a   :  { %v1040_v30 = vadd.f32 %v1039_v29, %v1925_v4 }
 0x32b   :  { %v1130_v31 = vpop.f32.mrf.mxu0 }
 0x32c   :  { %1196 = vst [vmem:[#allocation13 + $0x180] sm:$0xff] %v1040_v30  ;;  %v1131_v32 = vadd.f32 %v1130_v31, %v1922_v62 }
 0x32e   :  { %1199 = vst [vmem:[#allocation13 + $0x198] sm:$0xff] %v1131_v32 }
 0x331   :  { %v1041_v33 = vpop.f32.mrf.mxu3 }
 0x332   :  { %v1042_v34 = vadd.f32 %v1041_v33, %v1925_v4 }
 0x333   :  { %v1133_v35 = vpop.f32.mrf.mxu0 }
 0x334   :  { %1198 = vst [vmem:[#allocation13 + $0x190] sm:$0xff] %v1042_v34  ;;  %v1134_v36 = vadd.f32 %v1133_v35, %v1922_v62 }
 0x336   :  { %1201 = vst [vmem:[#allocation13 + $0x1a8] sm:$0xff] %v1134_v36 }
 0x339   :  { %v1044_v37 = vpop.f32.mrf.mxu3 }
 0x33a   :  { %v1045_v38 = vadd.f32 %v1044_v37, %v1925_v4 }
 0x33b   :  { %v1135_v39 = vpop.f32.mrf.mxu0 }
 0x33c   :  { %1200 = vst [vmem:[#allocation13 + $0x1a0] sm:$0xff] %v1045_v38  ;;  %v1136_v40 = vadd.f32 %v1135_v39, %v1922_v62 }
 0x33e   :  { %1203 = vst [vmem:[#allocation13 + $0x1b8] sm:$0xff] %v1136_v40 }
 0x341   :  { %v1046_v41 = vpop.f32.mrf.mxu3 }
 0x342   :  { %v1047_v42 = vadd.f32 %v1046_v41, %v1925_v4 }
 0x343   :  { %v1138_v43 = vpop.f32.mrf.mxu0 }
 0x344   :  { %1202 = vst [vmem:[#allocation13 + $0x1b0] sm:$0xff] %v1047_v42  ;;  %v1139_v45 = vadd.f32 %v1138_v43, %v1922_v62 }
 0x346   :  { %1205 = vst [vmem:[#allocation13 + $0x1c8] sm:$0xff] %v1139_v45 }
 0x349   :  { %v1049_v46 = vpop.f32.mrf.mxu3 }
 0x34a   :  { %v1050_v47 = vadd.f32 %v1049_v46, %v1925_v4 }
 0x34b   :  { %v1140_v48 = vpop.f32.mrf.mxu0 }
 0x34c   :  { %1204 = vst [vmem:[#allocation13 + $0x1c0] sm:$0xff] %v1050_v47  ;;  %v1141_v49 = vadd.f32 %v1140_v48, %v1922_v62 }
 0x34e   :  { %1207 = vst [vmem:[#allocation13 + $0x1d8] sm:$0xff] %v1141_v49 }
 0x351   :  { %v1051_v50 = vpop.f32.mrf.mxu3 }
 0x352   :  { %v1052_v51 = vadd.f32 %v1051_v50, %v1925_v4 }
 0x353   :  { %v1143_v52 = vpop.f32.mrf.mxu0 }
 0x354   :  { %1206 = vst [vmem:[#allocation13 + $0x1d0] sm:$0xff] %v1052_v51  ;;  %v1144_v28 = vadd.f32 %v1143_v52, %v1922_v62 }
 0x356   :  { %1209 = vst [vmem:[#allocation13 + $0x1e8] sm:$0xff] %v1144_v28 }
 0x359   :  { %v1054_v53 = vpop.f32.mrf.mxu3 }
 0x35a   :  { %v1055_v15 = vadd.f32 %v1054_v53, %v1925_v4 }
 0x35b   :  { %v1145_v54 = vpop.f32.mrf.mxu0 }
 0x35c   :  { %1208 = vst [vmem:[#allocation13 + $0x1e0] sm:$0xff] %v1055_v15  ;;  %v1146_v55 = vadd.f32 %v1145_v54, %v1922_v62 }
 0x35e   :  { %1211 = vst [vmem:[#allocation13 + $0x1f8] sm:$0xff] %v1146_v55 }
 0x361   :  { %v1056_v44 = vpop.f32.mrf.mxu3 }
 0x362   :  { %v1057_v56 = vadd.f32 %v1056_v44, %v1925_v4 }
 0x364   :  { %1210 = vst [vmem:[#allocation13 + $0x1f0] sm:$0xff] %v1057_v56 }
 0x365   :  { %1224 = dma.vmem_to_hbm [thread:$0]  %s1217_s20, 8192, %s1219_s1, [#allocation4], %s1743_s23, %s1743_s23, %s1744_s24  }
 0x366   :  { %1730 = dma.done.wait [#allocation4], 8192  }
 0x367   :  { %1731 = vsyncadd [#allocation4], 4294959104 }
 0x368   :  { %1229 = vsyncpa [#allocation3], 1 }
 0x369   :  { %1230 = vsyncpa [#allocation6], 1 }
 0x36a   :  { %1231 = vsyncpa [#allocation9], 1 }
 0x36b   :  { %1232 = vsyncpa [#allocation12], 1 }
 0x36c   :  { %1233 = vsyncpa [#allocation4], 1 }

</bundles_post_ra>
